<compile_context>
chip_gen: v7x
topology: tpu7x:2x2x1
jax: 0.10.0
libtpu: 0.0.40
codegen_flags: <defaults>
</compile_context>

<pallas_src>
import jax
import jax.numpy as jnp
from jax.experimental import pallas as pl
from jax.experimental.pallas import tpu as pltpu

_LANE_WIDTH = 1024  # lane-dense last dim (multiple of 128 -> full unmasked stores)


def _scale_kernel(inv_t_ref, x_ref, o_ref):
    # inv_t_ref: (1, 1) f32 scalar in SMEM; x_ref/o_ref: (tile_rows, 1024) VMEM tiles.
    o_ref[...] = (x_ref[...] * inv_t_ref[0, 0]).astype(o_ref.dtype)


def _vmem_budgets():
    """Returns (target_block_bytes, vmem_limit_bytes), chosen per chip generation."""
    cap = None
    try:
        cap = getattr(pltpu.get_tpu_info(), "vmem_capacity_bytes", None)
    except Exception:
        cap = None
    if cap is None:
        cap = 64 << 20  # conservative default: assume v7x-sized VMEM
    if int(cap) >= (128 << 20):
        # v5e / v6e: 128 MiB physical VMEM -> big tiles, generous scoped limit.
        return 8 << 20, 64 << 20
    # v7x: 64 MiB per TensorCore. 8 MiB tiles -> 4x live footprint = 32 MiB, keep headroom.
    return 8 << 20, 40 << 20


def temperature_scale(logits, temperature, *, small_input_bypass_bytes=1 << 20):
    """Elementwise logits / temperature; temperature is a shape-(1,) parameter."""
    orig_shape = logits.shape
    dtype = logits.dtype
    total = logits.size
    if total == 0:
        return logits

    # Hoist the reciprocal out of the kernel; keep it in float32 for precision.
    inv_t = 1.0 / temperature.astype(jnp.float32)  # shape (1,)

    itemsize = jnp.dtype(dtype).itemsize
    if total * itemsize < small_input_bypass_bytes:
        # Tiny input: a fused XLA elementwise op is already at roofline; the
        # kernel-launch + pad/slice round trip would dominate. Same math.
        return (logits * inv_t).astype(dtype)

    target_block_bytes, vmem_limit_bytes = _vmem_budgets()

    # Flatten to a lane-dense 2D slab: (rows, 1024).
    rows = pl.cdiv(total, _LANE_WIDTH)
    tile_rows = max(8, target_block_bytes // (_LANE_WIDTH * itemsize))  # 2048 @ f32
    if rows <= tile_rows:
        if rows > 8:
            # Ensure >=2 grid steps so v7x's two TensorCores both get work
            # (dimension_semantics=("parallel",) shards the grid across cores).
            tile_rows = pl.cdiv(pl.cdiv(rows, 2), 8) * 8
        else:
            tile_rows = rows  # single block == full (small) array

    # Pad only to fill the last 1024-wide lane row. Partial last *row blocks*
    # are handled by Pallas' masked boundary copies (grid uses cdiv), so
    # 1024-aligned totals take a zero-copy fast path (no pad, no output slice).
    padded_total = rows * _LANE_WIDTH
    flat = logits.reshape(-1)
    if padded_total != total:
        # TODO(synk): unaligned totals still materialize one padded input copy;
        # could be removed with allow_input_fusion or a separate <1024-elem tail op.
        flat = jnp.pad(flat, (0, padded_total - total))
    x2d = flat.reshape(rows, _LANE_WIDTH)

    grid = (pl.cdiv(rows, tile_rows),)
    out2d = pl.pallas_call(
        _scale_kernel,
        out_shape=jax.ShapeDtypeStruct((rows, _LANE_WIDTH), dtype),
        grid_spec=pltpu.PrefetchScalarGridSpec(
            num_scalar_prefetch=0,
            grid=grid,
            in_specs=[
                pl.BlockSpec(memory_space=pltpu.SMEM),                     # 1/T scalar
                pl.BlockSpec((tile_rows, _LANE_WIDTH), lambda i: (i, 0)),  # logits tile
            ],
            out_specs=pl.BlockSpec((tile_rows, _LANE_WIDTH), lambda i: (i, 0)),
        ),
        compiler_params=pltpu.CompilerParams(
            dimension_semantics=("parallel",),
            vmem_limit_bytes=vmem_limit_bytes,
        ),
    )(inv_t.reshape(1, 1), x2d)

    out_flat = out2d.reshape(-1)
    if padded_total != total:
        out_flat = out_flat[:total]
    return out_flat.reshape(orig_shape)


if __name__ == "__main__":
    key = jax.random.PRNGKey(0)
    n_samples, n_classes = 8, 32
    logits = jax.random.normal(key, (n_samples, n_classes), dtype=jnp.float32)

    # Deterministic parameter init, matching nn.Parameter(torch.ones(1) * 1.0)
    temperature = jnp.ones((1,), dtype=jnp.float32)

    # Small demo shape: force the Pallas path (the default would take the tiny-input bypass).
    out = temperature_scale(logits, temperature, small_input_bypass_bytes=0)
    jax.block_until_ready(out)
    assert out.shape == logits.shape
    assert jnp.allclose(out, logits / temperature, atol=1e-6), "mismatch vs reference (T=1.0)"

    # Non-trivial temperature, still through the kernel.
    temperature2 = jnp.array([2.5], dtype=jnp.float32)
    out2 = temperature_scale(logits, temperature2, small_input_bypass_bytes=0)
    jax.block_until_ready(out2)
    assert jnp.allclose(out2, logits / temperature2, atol=1e-5, rtol=1e-5), "mismatch (T=2.5)"

    # Default path on the tiny input: XLA bypass (no kernel launch), same result.
    out2b = temperature_scale(logits, temperature2)
    jax.block_until_ready(out2b)
    assert jnp.allclose(out2b, logits / temperature2, atol=1e-5, rtol=1e-5), "mismatch (bypass)"

    # 1024-aligned total: zero-copy fast path (no pad / no slice), 2-step grid.
    logits3 = jax.random.normal(jax.random.PRNGKey(1), (512, 1024), dtype=jnp.float32)
    out3 = temperature_scale(logits3, temperature2)
    jax.block_until_ready(out3)
    assert jnp.allclose(out3, logits3 / temperature2, atol=1e-5, rtol=1e-5), "mismatch (aligned)"

    # ImageNet-style (N, 1000): 1024-aligned total with a partial last row-block.
    logits4 = jax.random.normal(jax.random.PRNGKey(2), (512, 1000), dtype=jnp.float32)
    out4 = temperature_scale(logits4, temperature2)
    jax.block_until_ready(out4)
    assert jnp.allclose(out4, logits4 / temperature2, atol=1e-5, rtol=1e-5), "mismatch (1000-cls)"

    # Genuinely unaligned total: exercises the minimal pad/slice path.
    logits5 = jax.random.normal(jax.random.PRNGKey(3), (13, 40), dtype=jnp.float32)
    out5 = temperature_scale(logits5, temperature2, small_input_bypass_bytes=0)
    jax.block_until_ready(out5)
    assert jnp.allclose(out5, logits5 / temperature2, atol=1e-5, rtol=1e-5), "mismatch (padded)"

    print("KERNEL_OK")
</pallas_src>

<mosaic_0001>
module attributes {stable_mosaic.version = 11 : i64} {
  func.func @_scale_kernel(%arg0: i32, %arg1: memref<1x1xf32, #tpu.memory_space<smem>>, %arg2: memref<1x1024xf32, #tpu.memory_space<vmem>>, %arg3: memref<1x1024xf32, #tpu.memory_space<vmem>>) attributes {dimension_semantics = [#tpu.dimension_semantics<parallel>], iteration_bounds = array<i64: 1>, scalar_prefetch = 0 : i64, scratch_operands = 0 : i64, tpu.core_type = #tpu.core_type<tc>, window_params = [{transform_indices = @transform_0, window_bounds = array<i64: 1, 1>}, {transform_indices = @transform_1, window_bounds = array<i64: 1, 1024>}, {transform_indices = @transform_2, window_bounds = array<i64: 1, 1024>}]} {
    %c0 = arith.constant 0 : index
    %c0_0 = arith.constant 0 : index
    %0 = vector.load %arg2[%c0, %c0_0] : memref<1x1024xf32, #tpu.memory_space<vmem>>, vector<1x1024xf32>
    %c0_1 = arith.constant 0 : index
    %c0_2 = arith.constant 0 : index
    %1 = memref.load %arg1[%c0_1, %c0_2] : memref<1x1xf32, #tpu.memory_space<smem>>
    %2 = vector.broadcast %1 : f32 to vector<1x1024xf32>
    %3 = arith.mulf %0, %2 : vector<1x1024xf32>
    %c0_3 = arith.constant 0 : index
    %c0_4 = arith.constant 0 : index
    %4 = vector.load %arg3[%c0_3, %c0_4] : memref<1x1024xf32, #tpu.memory_space<vmem>>, vector<1x1024xf32>
    tpu.vector_store %arg3[%c0_3, %c0_4], %3 {strides = array<i32>} : memref<1x1024xf32, #tpu.memory_space<vmem>>, vector<1x1024xf32>,
    return
  }
  func.func @transform_0(%arg0: i32) -> (i32, i32) {
    %c0_i32 = arith.constant 0 : i32
    %c0_i32_0 = arith.constant 0 : i32
    %c0_i32_1 = arith.constant 0 : i32
    return %c0_i32, %c0_i32_0 : i32, i32
  }
  func.func @transform_1(%arg0: i32) -> (i32, i32) {
    %c0_i32 = arith.constant 0 : i32
    %c0_i32_0 = arith.constant 0 : i32
    return %arg0, %c0_i32 : i32, i32
  }
  func.func @transform_2(%arg0: i32) -> (i32, i32) {
    %c0_i32 = arith.constant 0 : i32
    %c0_i32_0 = arith.constant 0 : i32
    return %arg0, %c0_i32 : i32, i32
  }
}

</mosaic_0001>

<bundles_post_ra>
// kernel: tpu_custom_call.1
= control target key start
LH: loop header
LB: loop body
LE: loop exit
PB: predicated region body
PF: predicated region fallthrough
CT: control target
= control target key end

     0   :  { %8 = vsyncpa [#allocation4], 0  ;;  %s139_s0 = inlined_call_operand.<no memory space> [shape: f32[1,1], index: 0, kind: input, shape index: {}]   ;;  %s140_s1 = inlined_call_operand.hbm [shape: f32[1,1024], index: 1, kind: input, shape index: {}]   ;;  %s141_s2 = inlined_call_operand.hbm [shape: f32[1,1024], index: 2, kind: output, shape index: {}]  }
   0x1   :  { %9 = vsyncpa [#allocation5], 0  ;;  %s95_s9 = smov [#allocation3]   ;;  %s47_s13 = scalar_lea.hbm %s140_s1, 128 }
   0x2   :  { %s18_s10 = sshll.u32 %s95_s9, 4  ;;  %p48_p0 = scmp.ne.s32.totalorder %s140_s1, %s47_s13  ;;  %s19_s10 = int_to_ptr.vmem [resolvable:$true] %s18_s10 }
   0x3   :  { %p51_p1 = scmp.lt.u32.totalorder %s47_s13, %s140_s1 }
   0x5   :  { %p53_p2 = pnand %p51_p1, %p48_p0 }
   0x7   :  { %56 = shalt.err (!%p53_p2)
}
   0x8   :  { %s57_s18 = scalar_lea.vmem %s19_s10, 128  ;;  %p62_p4 = scmp.lt.s32.totalorder %s19_s10, %s19_s10 }
   0x9   :  { %p58_p3 = scmp.ne.s32.totalorder %s19_s10, %s57_s18  ;;  %p63_p5 = scmp.lt.s32.totalorder %s57_s18, %s57_s18 }
   0xb   :  { %p64_p6 = por %p63_p5, %p62_p4 }
   0xd   :  { %p65_p7 = pnand %p64_p6, %p58_p3 }
   0xf   :  { %68 = shalt.err (!%p65_p7)
}
  0x10   :  { %21 = dma.hbm_to_vmem [thread:$0]  %s140_s1, 128, %s19_s10, [#allocation4]  }
  0x11   :  { %91 = dma.done.wait [#allocation4], 128  }
  0x12   :  { %92 = vsyncadd [#allocation4], 4294967168  ;;  %v27_v0 = vstv %s139_s0  ;;  %s96_s23 = smov [#allocation6]   ;;  %v25_v1 = vld [vmem:[#allocation3] sm:$0xff] }
  0x13   :  { %s36_s24 = sshll.u32 %s96_s23, 4  ;;  %v28_v2 = vmul.f32 %v27_v0, %v25_v1  ;;  %s37_s24 = int_to_ptr.vmem [resolvable:$true] %s36_s24 }
  0x14   :  { %s69_s25 = scalar_lea.vmem %s37_s24, 128  ;;  %p74_p9 = scmp.lt.s32.totalorder %s37_s24, %s37_s24 }
  0x15   :  { %29 = vst [vmem:[#allocation6] sm:$0xff] %v28_v2  ;;  %p70_p8 = scmp.ne.s32.totalorder %s37_s24, %s69_s25  ;;  %p75_p10 = scmp.lt.s32.totalorder %s69_s25, %s69_s25 }
  0x17   :  { %p76_p11 = por %p75_p10, %p74_p9 }
  0x19   :  { %p77_p12 = pnand %p76_p11, %p70_p8 }
  0x1b   :  { %80 = shalt.err (!%p77_p12)
}
  0x1c   :  { %s81_s27 = scalar_lea.hbm %s141_s2, 128 }
  0x1d   :  { %p82_p13 = scmp.ne.s32.totalorder %s141_s2, %s81_s27  ;;  %p85_p0 = scmp.lt.u32.totalorder %s81_s27, %s141_s2 }
  0x1f   :  { %p87_p1 = pnand %p85_p0, %p82_p13 }
  0x21   :  { %90 = shalt.err (!%p87_p1)
}
  0x22   :  { %39 = dma.vmem_to_hbm [thread:$0]  %s37_s24, 128, %s141_s2, [#allocation5]  }
  0x23   :  { %93 = dma.done.wait [#allocation5], 128  }
  0x24   :  { %94 = vsyncadd [#allocation5], 4294967168 }
  0x25   :  { %43 = vsyncpa [#allocation4], 1 }
  0x26   :  { %44 = vsyncpa [#allocation5], 1 }

</bundles_post_ra>
